<compile_context>
chip_gen: v6e
topology: v6e:2x2x1
jax: 0.10.0
libtpu: 0.0.40
codegen_flags: <defaults>
</compile_context>

<pallas_src>
import functools

import jax
import jax.numpy as jnp
from jax.experimental import pallas as pl
from jax.experimental.pallas import tpu as pltpu

_LANES = 128


def _round_up(a, b):
    return ((a + b - 1) // b) * b


def _mlp_kernel(params_ref, x_ref, o_ref, *, hid):
    # params_ref: (3*hid + 1,) f32 in SMEM:
    #   [0 : hid)         -> w1 (hidden weights, one per unit)
    #   [hid : 2*hid)     -> b1 (hidden biases)
    #   [2*hid : 3*hid)   -> w2 (output weights)
    #   [3*hid]           -> b2 (output bias)
    # x_ref / o_ref: (block_rows, 128) lane-dense tiles of the flattened batch.
    x = x_ref[...]
    acc = jnp.zeros_like(x)
    # Statically unrolled over the hidden units: pure VPU work, no MXU.
    for j in range(hid):
        w1j = params_ref[j]
        b1j = params_ref[hid + j]
        w2j = params_ref[2 * hid + j]
        h = jnp.maximum(x * w1j + b1j, 0.0)   # ReLU(hidden unit j)
        acc = acc + h * w2j
    o_ref[...] = acc + params_ref[3 * hid]


def net_forward(x, w1, b1, w2, b2, *, max_block_rows=512):
    """Fused MLP forward: relu(x @ w1 + b1) @ w2 + b2, specialized for Fin=Fout=1.

    x:  (N, 1) float32
    w1: (1, H), b1: (1, H), w2: (H, 1), b2: (1, 1)
    returns (N, 1) float32
    """
    N, fin = x.shape
    assert fin == 1, "kernel is specialized for Linear(1, H) -> Linear(H, 1)"
    hid = w1.shape[-1]

    # Pack all scalars into one SMEM vector: [w1, b1, w2, b2].
    params = jnp.concatenate(
        [w1.reshape(-1), b1.reshape(-1), w2.reshape(-1), b2.reshape(-1)]
    ).astype(jnp.float32)

    # Lane-dense layout: batch on the lane axis, padded to the tile grid.
    rows = pl.cdiv(N, _LANES)
    block_rows = min(max_block_rows, _round_up(rows, 8))
    rows_padded = _round_up(rows, block_rows)
    total = rows_padded * _LANES

    x_flat = jnp.pad(x.reshape(-1).astype(jnp.float32), (0, total - N))
    x2d = x_flat.reshape(rows_padded, _LANES)

    grid = (rows_padded // block_rows,)

    y2d = pl.pallas_call(
        functools.partial(_mlp_kernel, hid=hid),
        out_shape=jax.ShapeDtypeStruct((rows_padded, _LANES), jnp.float32),
        grid_spec=pltpu.PrefetchScalarGridSpec(
            num_scalar_prefetch=1,  # params -> SMEM, passed first
            grid=grid,
            in_specs=[
                pl.BlockSpec((block_rows, _LANES), lambda i, p: (i, 0)),
            ],
            out_specs=pl.BlockSpec((block_rows, _LANES), lambda i, p: (i, 0)),
        ),
        compiler_params=pltpu.CompilerParams(
            dimension_semantics=("parallel",),
        ),
    )(params, x2d)

    return y2d.reshape(-1)[:N].reshape(N, 1)


def init_params(key):
    """Deterministic init mimicking PyTorch nn.Linear defaults
    (uniform in +/- 1/sqrt(fan_in))."""
    k1, k2, k3, k4 = jax.random.split(key, 4)
    bound1 = 1.0 / jnp.sqrt(1.0)   # fan_in of hidden = 1
    bound2 = 1.0 / jnp.sqrt(20.0)  # fan_in of predict = 20
    w1 = jax.random.uniform(k1, (1, 20), jnp.float32, -bound1, bound1)
    b1 = jax.random.uniform(k2, (1, 20), jnp.float32, -bound1, bound1)
    w2 = jax.random.uniform(k3, (20, 1), jnp.float32, -bound2, bound2)
    b2 = jax.random.uniform(k4, (1, 1), jnp.float32, -bound2, bound2)
    return w1, b1, w2, b2


if __name__ == "__main__":
    key = jax.random.PRNGKey(0)
    w1, b1, w2, b2 = init_params(key)

    # Same workload as the original script: x = linspace(-1, 1, 1000)[:, None].
    # N = 1000 is NOT a multiple of 128 -> exercises the padding/ragged path.
    N = 1000
    x = jnp.linspace(-1.0, 1.0, N, dtype=jnp.float32).reshape(N, 1)

    y = net_forward(x, w1, b1, w2, b2)
    y = jax.block_until_ready(y)

    # Reference in plain JAX to sanity-check semantics.
    h_ref = jnp.maximum(x @ w1 + b1, 0.0)
    y_ref = h_ref @ w2 + b2
    assert y.shape == (N, 1)
    assert jnp.allclose(y, y_ref, atol=1e-5, rtol=1e-5), "mismatch vs reference"

    print("KERNEL_OK")
</pallas_src>

<mosaic_0001>
module attributes {stable_mosaic.version = 11 : i64} {
  func.func @_mlp_kernel(%arg0: i32, %arg1: memref<61xf32, #tpu.memory_space<smem>>, %arg2: memref<8x128xf32, #tpu.memory_space<vmem>>, %arg3: memref<8x128xf32, #tpu.memory_space<vmem>>) attributes {dimension_semantics = [#tpu.dimension_semantics<parallel>], iteration_bounds = array<i64: 1>, scalar_prefetch = 1 : i64, scratch_operands = 0 : i64, tpu.core_type = #tpu.core_type<tc>, window_params = [{transform_indices = @transform_0, window_bounds = array<i64: 8, 128>}, {transform_indices = @transform_1, window_bounds = array<i64: 8, 128>}]} {
    %c0 = arith.constant 0 : index
    %c0_0 = arith.constant 0 : index
    %0 = vector.load %arg2[%c0, %c0_0] : memref<8x128xf32, #tpu.memory_space<vmem>>, vector<8x128xf32>
    %cst = arith.constant 0.000000e+00 : f32
    %1 = vector.broadcast %cst : f32 to vector<8x128xf32>
    %c0_1 = arith.constant 0 : index
    %2 = memref.load %arg1[%c0_1] : memref<61xf32, #tpu.memory_space<smem>>
    %c20 = arith.constant 20 : index
    %3 = memref.load %arg1[%c20] : memref<61xf32, #tpu.memory_space<smem>>
    %c40 = arith.constant 40 : index
    %4 = memref.load %arg1[%c40] : memref<61xf32, #tpu.memory_space<smem>>
    %5 = vector.broadcast %2 : f32 to vector<8x128xf32>
    %6 = arith.mulf %0, %5 : vector<8x128xf32>
    %7 = vector.broadcast %3 : f32 to vector<8x128xf32>
    %8 = arith.addf %6, %7 : vector<8x128xf32>
    %cst_2 = arith.constant 0.000000e+00 : f32
    %9 = vector.broadcast %cst_2 : f32 to vector<8x128xf32>
    %10 = arith.maximumf %8, %9 : vector<8x128xf32>
    %11 = vector.broadcast %4 : f32 to vector<8x128xf32>
    %12 = arith.mulf %10, %11 : vector<8x128xf32>
    %13 = arith.addf %1, %12 : vector<8x128xf32>
    %c1 = arith.constant 1 : index
    %14 = memref.load %arg1[%c1] : memref<61xf32, #tpu.memory_space<smem>>
    %c21 = arith.constant 21 : index
    %15 = memref.load %arg1[%c21] : memref<61xf32, #tpu.memory_space<smem>>
    %c41 = arith.constant 41 : index
    %16 = memref.load %arg1[%c41] : memref<61xf32, #tpu.memory_space<smem>>
    %17 = vector.broadcast %14 : f32 to vector<8x128xf32>
    %18 = arith.mulf %0, %17 : vector<8x128xf32>
    %19 = vector.broadcast %15 : f32 to vector<8x128xf32>
    %20 = arith.addf %18, %19 : vector<8x128xf32>
    %cst_3 = arith.constant 0.000000e+00 : f32
    %21 = vector.broadcast %cst_3 : f32 to vector<8x128xf32>
    %22 = arith.maximumf %20, %21 : vector<8x128xf32>
    %23 = vector.broadcast %16 : f32 to vector<8x128xf32>
    %24 = arith.mulf %22, %23 : vector<8x128xf32>
    %25 = arith.addf %13, %24 : vector<8x128xf32>
    %c2 = arith.constant 2 : index
    %26 = memref.load %arg1[%c2] : memref<61xf32, #tpu.memory_space<smem>>
    %c22 = arith.constant 22 : index
    %27 = memref.load %arg1[%c22] : memref<61xf32, #tpu.memory_space<smem>>
    %c42 = arith.constant 42 : index
    %28 = memref.load %arg1[%c42] : memref<61xf32, #tpu.memory_space<smem>>
    %29 = vector.broadcast %26 : f32 to vector<8x128xf32>
    %30 = arith.mulf %0, %29 : vector<8x128xf32>
    %31 = vector.broadcast %27 : f32 to vector<8x128xf32>
    %32 = arith.addf %30, %31 : vector<8x128xf32>
    %cst_4 = arith.constant 0.000000e+00 : f32
    %33 = vector.broadcast %cst_4 : f32 to vector<8x128xf32>
    %34 = arith.maximumf %32, %33 : vector<8x128xf32>
    %35 = vector.broadcast %28 : f32 to vector<8x128xf32>
    %36 = arith.mulf %34, %35 : vector<8x128xf32>
    %37 = arith.addf %25, %36 : vector<8x128xf32>
    %c3 = arith.constant 3 : index
    %38 = memref.load %arg1[%c3] : memref<61xf32, #tpu.memory_space<smem>>
    %c23 = arith.constant 23 : index
    %39 = memref.load %arg1[%c23] : memref<61xf32, #tpu.memory_space<smem>>
    %c43 = arith.constant 43 : index
    %40 = memref.load %arg1[%c43] : memref<61xf32, #tpu.memory_space<smem>>
    %41 = vector.broadcast %38 : f32 to vector<8x128xf32>
    %42 = arith.mulf %0, %41 : vector<8x128xf32>
    %43 = vector.broadcast %39 : f32 to vector<8x128xf32>
    %44 = arith.addf %42, %43 : vector<8x128xf32>
    %cst_5 = arith.constant 0.000000e+00 : f32
    %45 = vector.broadcast %cst_5 : f32 to vector<8x128xf32>
    %46 = arith.maximumf %44, %45 : vector<8x128xf32>
    %47 = vector.broadcast %40 : f32 to vector<8x128xf32>
    %48 = arith.mulf %46, %47 : vector<8x128xf32>
    %49 = arith.addf %37, %48 : vector<8x128xf32>
    %c4 = arith.constant 4 : index
    %50 = memref.load %arg1[%c4] : memref<61xf32, #tpu.memory_space<smem>>
    %c24 = arith.constant 24 : index
    %51 = memref.load %arg1[%c24] : memref<61xf32, #tpu.memory_space<smem>>
    %c44 = arith.constant 44 : index
    %52 = memref.load %arg1[%c44] : memref<61xf32, #tpu.memory_space<smem>>
    %53 = vector.broadcast %50 : f32 to vector<8x128xf32>
    %54 = arith.mulf %0, %53 : vector<8x128xf32>
    %55 = vector.broadcast %51 : f32 to vector<8x128xf32>
    %56 = arith.addf %54, %55 : vector<8x128xf32>
    %cst_6 = arith.constant 0.000000e+00 : f32
    %57 = vector.broadcast %cst_6 : f32 to vector<8x128xf32>
    %58 = arith.maximumf %56, %57 : vector<8x128xf32>
    %59 = vector.broadcast %52 : f32 to vector<8x128xf32>
    %60 = arith.mulf %58, %59 : vector<8x128xf32>
    %61 = arith.addf %49, %60 : vector<8x128xf32>
    %c5 = arith.constant 5 : index
    %62 = memref.load %arg1[%c5] : memref<61xf32, #tpu.memory_space<smem>>
    %c25 = arith.constant 25 : index
    %63 = memref.load %arg1[%c25] : memref<61xf32, #tpu.memory_space<smem>>
    %c45 = arith.constant 45 : index
    %64 = memref.load %arg1[%c45] : memref<61xf32, #tpu.memory_space<smem>>
    %65 = vector.broadcast %62 : f32 to vector<8x128xf32>
    %66 = arith.mulf %0, %65 : vector<8x128xf32>
    %67 = vector.broadcast %63 : f32 to vector<8x128xf32>
    %68 = arith.addf %66, %67 : vector<8x128xf32>
    %cst_7 = arith.constant 0.000000e+00 : f32
    %69 = vector.broadcast %cst_7 : f32 to vector<8x128xf32>
    %70 = arith.maximumf %68, %69 : vector<8x128xf32>
    %71 = vector.broadcast %64 : f32 to vector<8x128xf32>
    %72 = arith.mulf %70, %71 : vector<8x128xf32>
    %73 = arith.addf %61, %72 : vector<8x128xf32>
    %c6 = arith.constant 6 : index
    %74 = memref.load %arg1[%c6] : memref<61xf32, #tpu.memory_space<smem>>
    %c26 = arith.constant 26 : index
    %75 = memref.load %arg1[%c26] : memref<61xf32, #tpu.memory_space<smem>>
    %c46 = arith.constant 46 : index
    %76 = memref.load %arg1[%c46] : memref<61xf32, #tpu.memory_space<smem>>
    %77 = vector.broadcast %74 : f32 to vector<8x128xf32>
    %78 = arith.mulf %0, %77 : vector<8x128xf32>
    %79 = vector.broadcast %75 : f32 to vector<8x128xf32>
    %80 = arith.addf %78, %79 : vector<8x128xf32>
    %cst_8 = arith.constant 0.000000e+00 : f32
    %81 = vector.broadcast %cst_8 : f32 to vector<8x128xf32>
    %82 = arith.maximumf %80, %81 : vector<8x128xf32>
    %83 = vector.broadcast %76 : f32 to vector<8x128xf32>
    %84 = arith.mulf %82, %83 : vector<8x128xf32>
    %85 = arith.addf %73, %84 : vector<8x128xf32>
    %c7 = arith.constant 7 : index
    %86 = memref.load %arg1[%c7] : memref<61xf32, #tpu.memory_space<smem>>
    %c27 = arith.constant 27 : index
    %87 = memref.load %arg1[%c27] : memref<61xf32, #tpu.memory_space<smem>>
    %c47 = arith.constant 47 : index
    %88 = memref.load %arg1[%c47] : memref<61xf32, #tpu.memory_space<smem>>
    %89 = vector.broadcast %86 : f32 to vector<8x128xf32>
    %90 = arith.mulf %0, %89 : vector<8x128xf32>
    %91 = vector.broadcast %87 : f32 to vector<8x128xf32>
    %92 = arith.addf %90, %91 : vector<8x128xf32>
    %cst_9 = arith.constant 0.000000e+00 : f32
    %93 = vector.broadcast %cst_9 : f32 to vector<8x128xf32>
    %94 = arith.maximumf %92, %93 : vector<8x128xf32>
    %95 = vector.broadcast %88 : f32 to vector<8x128xf32>
    %96 = arith.mulf %94, %95 : vector<8x128xf32>
    %97 = arith.addf %85, %96 : vector<8x128xf32>
    %c8 = arith.constant 8 : index
    %98 = memref.load %arg1[%c8] : memref<61xf32, #tpu.memory_space<smem>>
    %c28 = arith.constant 28 : index
    %99 = memref.load %arg1[%c28] : memref<61xf32, #tpu.memory_space<smem>>
    %c48 = arith.constant 48 : index
    %100 = memref.load %arg1[%c48] : memref<61xf32, #tpu.memory_space<smem>>
    %101 = vector.broadcast %98 : f32 to vector<8x128xf32>
    %102 = arith.mulf %0, %101 : vector<8x128xf32>
    %103 = vector.broadcast %99 : f32 to vector<8x128xf32>
    %104 = arith.addf %102, %103 : vector<8x128xf32>
    %cst_10 = arith.constant 0.000000e+00 : f32
    %105 = vector.broadcast %cst_10 : f32 to vector<8x128xf32>
    %106 = arith.maximumf %104, %105 : vector<8x128xf32>
    %107 = vector.broadcast %100 : f32 to vector<8x128xf32>
    %108 = arith.mulf %106, %107 : vector<8x128xf32>
    %109 = arith.addf %97, %108 : vector<8x128xf32>
    %c9 = arith.constant 9 : index
    %110 = memref.load %arg1[%c9] : memref<61xf32, #tpu.memory_space<smem>>
    %c29 = arith.constant 29 : index
    %111 = memref.load %arg1[%c29] : memref<61xf32, #tpu.memory_space<smem>>
    %c49 = arith.constant 49 : index
    %112 = memref.load %arg1[%c49] : memref<61xf32, #tpu.memory_space<smem>>
    %113 = vector.broadcast %110 : f32 to vector<8x128xf32>
    %114 = arith.mulf %0, %113 : vector<8x128xf32>
    %115 = vector.broadcast %111 : f32 to vector<8x128xf32>
    %116 = arith.addf %114, %115 : vector<8x128xf32>
    %cst_11 = arith.constant 0.000000e+00 : f32
    %117 = vector.broadcast %cst_11 : f32 to vector<8x128xf32>
    %118 = arith.maximumf %116, %117 : vector<8x128xf32>
    %119 = vector.broadcast %112 : f32 to vector<8x128xf32>
    %120 = arith.mulf %118, %119 : vector<8x128xf32>
    %121 = arith.addf %109, %120 : vector<8x128xf32>
    %c10 = arith.constant 10 : index
    %122 = memref.load %arg1[%c10] : memref<61xf32, #tpu.memory_space<smem>>
    %c30 = arith.constant 30 : index
    %123 = memref.load %arg1[%c30] : memref<61xf32, #tpu.memory_space<smem>>
    %c50 = arith.constant 50 : index
    %124 = memref.load %arg1[%c50] : memref<61xf32, #tpu.memory_space<smem>>
    %125 = vector.broadcast %122 : f32 to vector<8x128xf32>
    %126 = arith.mulf %0, %125 : vector<8x128xf32>
    %127 = vector.broadcast %123 : f32 to vector<8x128xf32>
    %128 = arith.addf %126, %127 : vector<8x128xf32>
    %cst_12 = arith.constant 0.000000e+00 : f32
    %129 = vector.broadcast %cst_12 : f32 to vector<8x128xf32>
    %130 = arith.maximumf %128, %129 : vector<8x128xf32>
    %131 = vector.broadcast %124 : f32 to vector<8x128xf32>
    %132 = arith.mulf %130, %131 : vector<8x128xf32>
    %133 = arith.addf %121, %132 : vector<8x128xf32>
    %c11 = arith.constant 11 : index
    %134 = memref.load %arg1[%c11] : memref<61xf32, #tpu.memory_space<smem>>
    %c31 = arith.constant 31 : index
    %135 = memref.load %arg1[%c31] : memref<61xf32, #tpu.memory_space<smem>>
    %c51 = arith.constant 51 : index
    %136 = memref.load %arg1[%c51] : memref<61xf32, #tpu.memory_space<smem>>
    %137 = vector.broadcast %134 : f32 to vector<8x128xf32>
    %138 = arith.mulf %0, %137 : vector<8x128xf32>
    %139 = vector.broadcast %135 : f32 to vector<8x128xf32>
    %140 = arith.addf %138, %139 : vector<8x128xf32>
    %cst_13 = arith.constant 0.000000e+00 : f32
    %141 = vector.broadcast %cst_13 : f32 to vector<8x128xf32>
    %142 = arith.maximumf %140, %141 : vector<8x128xf32>
    %143 = vector.broadcast %136 : f32 to vector<8x128xf32>
    %144 = arith.mulf %142, %143 : vector<8x128xf32>
    %145 = arith.addf %133, %144 : vector<8x128xf32>
    %c12 = arith.constant 12 : index
    %146 = memref.load %arg1[%c12] : memref<61xf32, #tpu.memory_space<smem>>
    %c32 = arith.constant 32 : index
    %147 = memref.load %arg1[%c32] : memref<61xf32, #tpu.memory_space<smem>>
    %c52 = arith.constant 52 : index
    %148 = memref.load %arg1[%c52] : memref<61xf32, #tpu.memory_space<smem>>
    %149 = vector.broadcast %146 : f32 to vector<8x128xf32>
    %150 = arith.mulf %0, %149 : vector<8x128xf32>
    %151 = vector.broadcast %147 : f32 to vector<8x128xf32>
    %152 = arith.addf %150, %151 : vector<8x128xf32>
    %cst_14 = arith.constant 0.000000e+00 : f32
    %153 = vector.broadcast %cst_14 : f32 to vector<8x128xf32>
    %154 = arith.maximumf %152, %153 : vector<8x128xf32>
    %155 = vector.broadcast %148 : f32 to vector<8x128xf32>
    %156 = arith.mulf %154, %155 : vector<8x128xf32>
    %157 = arith.addf %145, %156 : vector<8x128xf32>
    %c13 = arith.constant 13 : index
    %158 = memref.load %arg1[%c13] : memref<61xf32, #tpu.memory_space<smem>>
    %c33 = arith.constant 33 : index
    %159 = memref.load %arg1[%c33] : memref<61xf32, #tpu.memory_space<smem>>
    %c53 = arith.constant 53 : index
    %160 = memref.load %arg1[%c53] : memref<61xf32, #tpu.memory_space<smem>>
    %161 = vector.broadcast %158 : f32 to vector<8x128xf32>
    %162 = arith.mulf %0, %161 : vector<8x128xf32>
    %163 = vector.broadcast %159 : f32 to vector<8x128xf32>
    %164 = arith.addf %162, %163 : vector<8x128xf32>
    %cst_15 = arith.constant 0.000000e+00 : f32
    %165 = vector.broadcast %cst_15 : f32 to vector<8x128xf32>
    %166 = arith.maximumf %164, %165 : vector<8x128xf32>
    %167 = vector.broadcast %160 : f32 to vector<8x128xf32>
    %168 = arith.mulf %166, %167 : vector<8x128xf32>
    %169 = arith.addf %157, %168 : vector<8x128xf32>
    %c14 = arith.constant 14 : index
    %170 = memref.load %arg1[%c14] : memref<61xf32, #tpu.memory_space<smem>>
    %c34 = arith.constant 34 : index
    %171 = memref.load %arg1[%c34] : memref<61xf32, #tpu.memory_space<smem>>
    %c54 = arith.constant 54 : index
    %172 = memref.load %arg1[%c54] : memref<61xf32, #tpu.memory_space<smem>>
    %173 = vector.broadcast %170 : f32 to vector<8x128xf32>
    %174 = arith.mulf %0, %173 : vector<8x128xf32>
    %175 = vector.broadcast %171 : f32 to vector<8x128xf32>
    %176 = arith.addf %174, %175 : vector<8x128xf32>
    %cst_16 = arith.constant 0.000000e+00 : f32
    %177 = vector.broadcast %cst_16 : f32 to vector<8x128xf32>
    %178 = arith.maximumf %176, %177 : vector<8x128xf32>
    %179 = vector.broadcast %172 : f32 to vector<8x128xf32>
    %180 = arith.mulf %178, %179 : vector<8x128xf32>
    %181 = arith.addf %169, %180 : vector<8x128xf32>
    %c15 = arith.constant 15 : index
    %182 = memref.load %arg1[%c15] : memref<61xf32, #tpu.memory_space<smem>>
    %c35 = arith.constant 35 : index
    %183 = memref.load %arg1[%c35] : memref<61xf32, #tpu.memory_space<smem>>
    %c55 = arith.constant 55 : index
    %184 = memref.load %arg1[%c55] : memref<61xf32, #tpu.memory_space<smem>>
    %185 = vector.broadcast %182 : f32 to vector<8x128xf32>
    %186 = arith.mulf %0, %185 : vector<8x128xf32>
    %187 = vector.broadcast %183 : f32 to vector<8x128xf32>
    %188 = arith.addf %186, %187 : vector<8x128xf32>
    %cst_17 = arith.constant 0.000000e+00 : f32
    %189 = vector.broadcast %cst_17 : f32 to vector<8x128xf32>
    %190 = arith.maximumf %188, %189 : vector<8x128xf32>
    %191 = vector.broadcast %184 : f32 to vector<8x128xf32>
    %192 = arith.mulf %190, %191 : vector<8x128xf32>
    %193 = arith.addf %181, %192 : vector<8x128xf32>
    %c16 = arith.constant 16 : index
    %194 = memref.load %arg1[%c16] : memref<61xf32, #tpu.memory_space<smem>>
    %c36 = arith.constant 36 : index
    %195 = memref.load %arg1[%c36] : memref<61xf32, #tpu.memory_space<smem>>
    %c56 = arith.constant 56 : index
    %196 = memref.load %arg1[%c56] : memref<61xf32, #tpu.memory_space<smem>>
    %197 = vector.broadcast %194 : f32 to vector<8x128xf32>
    %198 = arith.mulf %0, %197 : vector<8x128xf32>
    %199 = vector.broadcast %195 : f32 to vector<8x128xf32>
    %200 = arith.addf %198, %199 : vector<8x128xf32>
    %cst_18 = arith.constant 0.000000e+00 : f32
    %201 = vector.broadcast %cst_18 : f32 to vector<8x128xf32>
    %202 = arith.maximumf %200, %201 : vector<8x128xf32>
    %203 = vector.broadcast %196 : f32 to vector<8x128xf32>
    %204 = arith.mulf %202, %203 : vector<8x128xf32>
    %205 = arith.addf %193, %204 : vector<8x128xf32>
    %c17 = arith.constant 17 : index
    %206 = memref.load %arg1[%c17] : memref<61xf32, #tpu.memory_space<smem>>
    %c37 = arith.constant 37 : index
    %207 = memref.load %arg1[%c37] : memref<61xf32, #tpu.memory_space<smem>>
    %c57 = arith.constant 57 : index
    %208 = memref.load %arg1[%c57] : memref<61xf32, #tpu.memory_space<smem>>
    %209 = vector.broadcast %206 : f32 to vector<8x128xf32>
    %210 = arith.mulf %0, %209 : vector<8x128xf32>
    %211 = vector.broadcast %207 : f32 to vector<8x128xf32>
    %212 = arith.addf %210, %211 : vector<8x128xf32>
    %cst_19 = arith.constant 0.000000e+00 : f32
    %213 = vector.broadcast %cst_19 : f32 to vector<8x128xf32>
    %214 = arith.maximumf %212, %213 : vector<8x128xf32>
    %215 = vector.broadcast %208 : f32 to vector<8x128xf32>
    %216 = arith.mulf %214, %215 : vector<8x128xf32>
    %217 = arith.addf %205, %216 : vector<8x128xf32>
    %c18 = arith.constant 18 : index
    %218 = memref.load %arg1[%c18] : memref<61xf32, #tpu.memory_space<smem>>
    %c38 = arith.constant 38 : index
    %219 = memref.load %arg1[%c38] : memref<61xf32, #tpu.memory_space<smem>>
    %c58 = arith.constant 58 : index
    %220 = memref.load %arg1[%c58] : memref<61xf32, #tpu.memory_space<smem>>
    %221 = vector.broadcast %218 : f32 to vector<8x128xf32>
    %222 = arith.mulf %0, %221 : vector<8x128xf32>
    %223 = vector.broadcast %219 : f32 to vector<8x128xf32>
    %224 = arith.addf %222, %223 : vector<8x128xf32>
    %cst_20 = arith.constant 0.000000e+00 : f32
    %225 = vector.broadcast %cst_20 : f32 to vector<8x128xf32>
    %226 = arith.maximumf %224, %225 : vector<8x128xf32>
    %227 = vector.broadcast %220 : f32 to vector<8x128xf32>
    %228 = arith.mulf %226, %227 : vector<8x128xf32>
    %229 = arith.addf %217, %228 : vector<8x128xf32>
    %c19 = arith.constant 19 : index
    %230 = memref.load %arg1[%c19] : memref<61xf32, #tpu.memory_space<smem>>
    %c39 = arith.constant 39 : index
    %231 = memref.load %arg1[%c39] : memref<61xf32, #tpu.memory_space<smem>>
    %c59 = arith.constant 59 : index
    %232 = memref.load %arg1[%c59] : memref<61xf32, #tpu.memory_space<smem>>
    %233 = vector.broadcast %230 : f32 to vector<8x128xf32>
    %234 = arith.mulf %0, %233 : vector<8x128xf32>
    %235 = vector.broadcast %231 : f32 to vector<8x128xf32>
    %236 = arith.addf %234, %235 : vector<8x128xf32>
    %cst_21 = arith.constant 0.000000e+00 : f32
    %237 = vector.broadcast %cst_21 : f32 to vector<8x128xf32>
    %238 = arith.maximumf %236, %237 : vector<8x128xf32>
    %239 = vector.broadcast %232 : f32 to vector<8x128xf32>
    %240 = arith.mulf %238, %239 : vector<8x128xf32>
    %241 = arith.addf %229, %240 : vector<8x128xf32>
    %c60 = arith.constant 60 : index
    %242 = memref.load %arg1[%c60] : memref<61xf32, #tpu.memory_space<smem>>
    %243 = vector.broadcast %242 : f32 to vector<8x128xf32>
    %244 = arith.addf %241, %243 : vector<8x128xf32>
    %c0_22 = arith.constant 0 : index
    %c0_23 = arith.constant 0 : index
    %245 = vector.load %arg3[%c0_22, %c0_23] : memref<8x128xf32, #tpu.memory_space<vmem>>, vector<8x128xf32>
    tpu.vector_store %arg3[%c0_22, %c0_23], %244 {strides = array<i32>} : memref<8x128xf32, #tpu.memory_space<vmem>>, vector<8x128xf32>,
    return
  }
  func.func @transform_0(%arg0: i32, %arg1: memref<61xf32, #tpu.memory_space<smem>>) -> (i32, i32) {
    %c0_i32 = arith.constant 0 : i32
    %c0_i32_0 = arith.constant 0 : i32
    return %arg0, %c0_i32 : i32, i32
  }
  func.func @transform_1(%arg0: i32, %arg1: memref<61xf32, #tpu.memory_space<smem>>) -> (i32, i32) {
    %c0_i32 = arith.constant 0 : i32
    %c0_i32_0 = arith.constant 0 : i32
    return %arg0, %c0_i32 : i32, i32
  }
}

</mosaic_0001>

<bundles_post_ra>
// kernel: tpu_custom_call.1
= control target key start
LH: loop header
LB: loop body
LE: loop exit
PB: predicated region body
PF: predicated region fallthrough
CT: control target
= control target key end

     0   :  { %s383_s9 = smov [#allocation3]   ;;  %s483_s0 = inlined_call_operand.hbm [shape: f32[61], index: 0, kind: input, shape index: {}]   ;;  %s484_s1 = inlined_call_operand.hbm [shape: f32[8,128], index: 1, kind: input, shape index: {}]   ;;  %s485_s2 = inlined_call_operand.hbm [shape: f32[8,128], index: 2, kind: output, shape index: {}]  }
   0x1   :  { %8 = dma.hbm_to_smem %s483_s0, 16, %s383_s9, [#allocation2] }
   0x2   :  { %377 = dma.done.wait [#allocation2], 16 }
   0x3   :  { %378 = vsyncadd [#allocation2], 4294967280 }
   0x4   :  { %10 = sfence }
   0x5   :  { %11 = vsyncpa [#allocation5], 0 }
   0x6   :  { %12 = vsyncpa [#allocation6], 0  ;;  %s384_s12 = smov [#allocation4]  }
   0x7   :  { %s19_s13 = sshll.u32 %s384_s12, 4  ;;  %s20_s13 = int_to_ptr.vmem [resolvable:$true] %s19_s13 }
   0x8   :  { %s345_s14 = scalar_lea.vmem %s20_s13, 128  ;;  %p350_p1 = scmp.lt.s32.totalorder %s20_s13, %s20_s13 }
   0x9   :  { %p346_p0 = scmp.ne.s32.totalorder %s20_s13, %s345_s14  ;;  %p351_p2 = scmp.lt.s32.totalorder %s345_s14, %s345_s14 }
   0xb   :  { %p352_p3 = por %p351_p2, %p350_p1 }
   0xd   :  { %p353_p4 = pnand %p352_p3, %p346_p0 }
   0xf   :  { %356 = shalt.err (!%p353_p4)
}
  0x10   :  { %22 = dma.hbm_to_vmem [thread:$0]  %s484_s1, 128, %s20_s13, [#allocation5]  }
  0x11   :  { %379 = dma.done.wait [#allocation5], 128  }
  0x12   :  { %380 = vsyncadd [#allocation5], 4294967168  ;;  %s27_s0 = sld [smem:[#allocation3]]  ;;  %v407_v0 = vld [vmem:[#allocation4] sm:$0xff] }
  0x13   :  { %s266_s17 = sld [smem:[#allocation3 + $0x14]] }
  0x14   :  { %s267_s18 = sld [smem:[#allocation3 + $0x28]] }
  0x15   :  { %s268_s19 = sld [smem:[#allocation3 + $0x1]] }
  0x16   :  { %s269_s20 = sld [smem:[#allocation3 + $0x15]] }
  0x17   :  { %s270_s21 = sld [smem:[#allocation3 + $0x29]] }
  0x18   :  { %v30_v1 = vstv %s27_s0  ;;  %s271_s22 = sld [smem:[#allocation3 + $0x2]] }
  0x19   :  { %v31_v2 = vmul.f32 %v30_v1, %v407_v0  ;;  %v32_v3 = vstv %s266_s17  ;;  %s272_s23 = sld [smem:[#allocation3 + $0x16]] }
  0x1a   :  { %s410_s24 = sld [smem:[#allocation3 + $0x2a]]  ;;  %v35_v9 = vstv %s267_s18 }
  0x1b   :  { %v33_v4 = vadd.f32 %v32_v3, %v31_v2  ;;  %v41_v5 = vstv %s268_s19  ;;  %s274_s1 = sld [smem:[#allocation3 + $0x3]] }
  0x1c   :  { %v42_v6 = vmul.f32 %v41_v5, %v407_v0  ;;  %v43_v7 = vstv %s269_s20  ;;  %s275_s25 = sld [smem:[#allocation3 + $0x17]] }
  0x1d   :  { %v34_v8 = vmax.f32 %v33_v4, 0.0  ;;  %s413_s26 = sld [smem:[#allocation3 + $0x2b]]  ;;  %v46_v12 = vstv %s270_s21 }
  0x1e   :  { %v44_v10 = vadd.f32 %v43_v7, %v42_v6  ;;  %v52_v11 = vstv %s271_s22  ;;  %s277_s27 = sld [smem:[#allocation3 + $0x4]] }
  0x1f   :  { %v53_v13 = vmul.f32 %v52_v11, %v407_v0  ;;  %v54_v14 = vstv %s272_s23  ;;  %s278_s28 = sld [smem:[#allocation3 + $0x18]]  ;;  %v36_v15 = vmul.f32 %v35_v9, %v34_v8 }
  0x20   :  { %v45_v16 = vmax.f32 %v44_v10, 0.0  ;;  %s416_s29 = sld [smem:[#allocation3 + $0x2c]]  ;;  %v57_v20 = vstv %s410_s24 }
  0x21   :  { %v55_v17 = vadd.f32 %v54_v14, %v53_v13  ;;  %v63_v18 = vstv %s274_s1  ;;  %s280_s30 = sld [smem:[#allocation3 + $0x5]] }
  0x22   :  { %v47_v19 = vmul.f32 %v46_v12, %v45_v16  ;;  %v64_v21 = vmul.f32 %v63_v18, %v407_v0  ;;  %v65_v22 = vstv %s275_s25  ;;  %s281_s3 = sld [smem:[#allocation3 + $0x19]] }
  0x23   :  { %v56_v23 = vmax.f32 %v55_v17, 0.0  ;;  %s420_s4 = sld [smem:[#allocation3 + $0x2d]]  ;;  %v68_v28 = vstv %s413_s26 }
  0x24   :  { %v48_v24 = vadd.f32 %v47_v19, %v36_v15  ;;  %v66_v25 = vadd.f32 %v65_v22, %v64_v21  ;;  %v74_v26 = vstv %s277_s27  ;;  %s283_s5 = sld [smem:[#allocation3 + $0x6]] }
  0x25   :  { %v58_v27 = vmul.f32 %v57_v20, %v56_v23  ;;  %v75_v29 = vmul.f32 %v74_v26, %v407_v0  ;;  %v76_v30 = vstv %s278_s28  ;;  %s284_s6 = sld [smem:[#allocation3 + $0x1a]] }
  0x26   :  { %v67_v31 = vmax.f32 %v66_v25, 0.0  ;;  %s424_s7 = sld [smem:[#allocation3 + $0x2e]]  ;;  %v79_v36 = vstv %s416_s29 }
  0x27   :  { %v59_v32 = vadd.f32 %v58_v27, %v48_v24  ;;  %v77_v33 = vadd.f32 %v76_v30, %v75_v29  ;;  %v85_v34 = vstv %s280_s30  ;;  %s286_s8 = sld [smem:[#allocation3 + $0x7]] }
  0x28   :  { %v69_v35 = vmul.f32 %v68_v28, %v67_v31  ;;  %v86_v37 = vmul.f32 %v85_v34, %v407_v0  ;;  %v87_v38 = vstv %s281_s3  ;;  %s287_s9 = sld [smem:[#allocation3 + $0x1b]] }
  0x29   :  { %v78_v39 = vmax.f32 %v77_v33, 0.0  ;;  %s428_s10 = sld [smem:[#allocation3 + $0x2f]]  ;;  %v90_v44 = vstv %s420_s4 }
  0x2a   :  { %v70_v40 = vadd.f32 %v69_v35, %v59_v32  ;;  %v88_v41 = vadd.f32 %v87_v38, %v86_v37  ;;  %v96_v42 = vstv %s283_s5  ;;  %s289_s11 = sld [smem:[#allocation3 + $0x8]] }
  0x2b   :  { %v80_v43 = vmul.f32 %v79_v36, %v78_v39  ;;  %v97_v45 = vmul.f32 %v96_v42, %v407_v0  ;;  %v98_v46 = vstv %s284_s6  ;;  %s290_s12 = sld [smem:[#allocation3 + $0x1c]] }
  0x2c   :  { %v89_v47 = vmax.f32 %v88_v41, 0.0  ;;  %s432_s13 = sld [smem:[#allocation3 + $0x30]]  ;;  %v101_v52 = vstv %s424_s7 }
  0x2d   :  { %v81_v48 = vadd.f32 %v80_v43, %v70_v40  ;;  %v99_v49 = vadd.f32 %v98_v46, %v97_v45  ;;  %v107_v50 = vstv %s286_s8  ;;  %s292_s14 = sld [smem:[#allocation3 + $0x9]] }
  0x2e   :  { %v91_v51 = vmul.f32 %v90_v44, %v89_v47  ;;  %v108_v53 = vmul.f32 %v107_v50, %v407_v0  ;;  %v109_v54 = vstv %s287_s9  ;;  %s293_s15 = sld [smem:[#allocation3 + $0x1d]] }
  0x2f   :  { %v100_v55 = vmax.f32 %v99_v49, 0.0  ;;  %s436_s16 = sld [smem:[#allocation3 + $0x31]]  ;;  %v112_v60 = vstv %s428_s10 }
  0x30   :  { %v92_v56 = vadd.f32 %v91_v51, %v81_v48  ;;  %v110_v57 = vadd.f32 %v109_v54, %v108_v53  ;;  %v118_v58 = vstv %s289_s11  ;;  %s295_s0 = sld [smem:[#allocation3 + $0xa]] }
  0x31   :  { %v102_v59 = vmul.f32 %v101_v52, %v100_v55  ;;  %v119_v61 = vmul.f32 %v118_v58, %v407_v0  ;;  %v120_v62 = vstv %s290_s12  ;;  %s296_s17 = sld [smem:[#allocation3 + $0x1e]] }
  0x32   :  { %v111_v63 = vmax.f32 %v110_v57, 0.0  ;;  %s440_s18 = sld [smem:[#allocation3 + $0x32]]  ;;  %v123_v5 = vstv %s432_s13 }
  0x33   :  { %v103_v1 = vadd.f32 %v102_v59, %v92_v56  ;;  %v121_v2 = vadd.f32 %v120_v62, %v119_v61  ;;  %v129_v3 = vstv %s292_s14  ;;  %s298_s19 = sld [smem:[#allocation3 + $0xb]] }
  0x34   :  { %v113_v4 = vmul.f32 %v112_v60, %v111_v63  ;;  %v130_v6 = vmul.f32 %v129_v3, %v407_v0  ;;  %v131_v7 = vstv %s293_s15  ;;  %s299_s20 = sld [smem:[#allocation3 + $0x1f]] }
  0x35   :  { %v122_v8 = vmax.f32 %v121_v2, 0.0  ;;  %s444_s21 = sld [smem:[#allocation3 + $0x33]]  ;;  %v134_v13 = vstv %s436_s16 }
  0x36   :  { %v114_v9 = vadd.f32 %v113_v4, %v103_v1  ;;  %v132_v10 = vadd.f32 %v131_v7, %v130_v6  ;;  %v140_v11 = vstv %s295_s0  ;;  %s301_s22 = sld [smem:[#allocation3 + $0xc]] }
  0x37   :  { %v124_v12 = vmul.f32 %v123_v5, %v122_v8  ;;  %v141_v14 = vmul.f32 %v140_v11, %v407_v0  ;;  %v142_v15 = vstv %s296_s17  ;;  %s302_s23 = sld [smem:[#allocation3 + $0x20]]  ;;  %s385_s17 = smov [#allocation7]  }
  0x38   :  { %v133_v16 = vmax.f32 %v132_v10, 0.0  ;;  %s448_s24 = sld [smem:[#allocation3 + $0x34]]  ;;  %v145_v21 = vstv %s440_s18  ;;  %s257_s18 = sshll.u32 %s385_s17, 4  ;;  %s258_s18 = int_to_ptr.vmem [resolvable:$true] %s257_s18 }
  0x39   :  { %v125_v17 = vadd.f32 %v124_v12, %v114_v9  ;;  %v143_v18 = vadd.f32 %v142_v15, %v141_v14  ;;  %v151_v19 = vstv %s298_s19  ;;  %s304_s1 = sld [smem:[#allocation3 + $0xd]]  ;;  %s357_s19 = scalar_lea.vmem %s258_s18, 128 }
  0x3a   :  { %v135_v20 = vmul.f32 %v134_v13, %v133_v16  ;;  %v152_v22 = vmul.f32 %v151_v19, %v407_v0  ;;  %v153_v23 = vstv %s299_s20  ;;  %s305_s25 = sld [smem:[#allocation3 + $0x21]]  ;;  %p358_p5 = scmp.ne.s32.totalorder %s258_s18, %s357_s19 }
  0x3b   :  { %v144_v24 = vmax.f32 %v143_v18, 0.0  ;;  %s452_s26 = sld [smem:[#allocation3 + $0x35]]  ;;  %v156_v29 = vstv %s444_s21  ;;  %p362_p6 = scmp.lt.s32.totalorder %s258_s18, %s258_s18 }
  0x3c   :  { %v136_v25 = vadd.f32 %v135_v20, %v125_v17  ;;  %v154_v26 = vadd.f32 %v153_v23, %v152_v22  ;;  %v162_v27 = vstv %s301_s22  ;;  %s307_s27 = sld [smem:[#allocation3 + $0xe]]  ;;  %p363_p7 = scmp.lt.s32.totalorder %s357_s19, %s357_s19 }
  0x3d   :  { %v146_v28 = vmul.f32 %v145_v21, %v144_v24  ;;  %v163_v30 = vmul.f32 %v162_v27, %v407_v0  ;;  %v164_v31 = vstv %s302_s23  ;;  %s308_s28 = sld [smem:[#allocation3 + $0x22]] }
  0x3e   :  { %v155_v32 = vmax.f32 %v154_v26, 0.0  ;;  %s456_s29 = sld [smem:[#allocation3 + $0x36]]  ;;  %v167_v37 = vstv %s448_s24  ;;  %p364_p8 = por %p363_p7, %p362_p6 }
  0x3f   :  { %v147_v33 = vadd.f32 %v146_v28, %v136_v25  ;;  %v165_v34 = vadd.f32 %v164_v31, %v163_v30  ;;  %v173_v35 = vstv %s304_s1  ;;  %s310_s30 = sld [smem:[#allocation3 + $0xf]] }
  0x40   :  { %v157_v36 = vmul.f32 %v156_v29, %v155_v32  ;;  %v174_v38 = vmul.f32 %v173_v35, %v407_v0  ;;  %v175_v39 = vstv %s305_s25  ;;  %s311_s3 = sld [smem:[#allocation3 + $0x23]]  ;;  %p365_p9 = pnand %p364_p8, %p358_p5 }
  0x41   :  { %v166_v40 = vmax.f32 %v165_v34, 0.0  ;;  %s460_s4 = sld [smem:[#allocation3 + $0x37]]  ;;  %v178_v45 = vstv %s452_s26 }
  0x42   :  { %v158_v41 = vadd.f32 %v157_v36, %v147_v33  ;;  %v176_v42 = vadd.f32 %v175_v39, %v174_v38  ;;  %v184_v43 = vstv %s307_s27  ;;  %s313_s5 = sld [smem:[#allocation3 + $0x10]] }
  0x43   :  { %v168_v44 = vmul.f32 %v167_v37, %v166_v40  ;;  %v185_v46 = vmul.f32 %v184_v43, %v407_v0  ;;  %v186_v47 = vstv %s308_s28  ;;  %s314_s6 = sld [smem:[#allocation3 + $0x24]] }
  0x44   :  { %v177_v48 = vmax.f32 %v176_v42, 0.0  ;;  %s464_s7 = sld [smem:[#allocation3 + $0x38]]  ;;  %v189_v53 = vstv %s456_s29 }
  0x45   :  { %v169_v49 = vadd.f32 %v168_v44, %v158_v41  ;;  %v187_v50 = vadd.f32 %v186_v47, %v185_v46  ;;  %v195_v51 = vstv %s310_s30  ;;  %s316_s8 = sld [smem:[#allocation3 + $0x11]] }
  0x46   :  { %v179_v52 = vmul.f32 %v178_v45, %v177_v48  ;;  %v196_v54 = vmul.f32 %v195_v51, %v407_v0  ;;  %v197_v55 = vstv %s311_s3  ;;  %s317_s9 = sld [smem:[#allocation3 + $0x25]] }
  0x47   :  { %v188_v56 = vmax.f32 %v187_v50, 0.0  ;;  %s468_s10 = sld [smem:[#allocation3 + $0x39]]  ;;  %v200_v61 = vstv %s460_s4 }
  0x48   :  { %v180_v57 = vadd.f32 %v179_v52, %v169_v49  ;;  %v198_v58 = vadd.f32 %v197_v55, %v196_v54  ;;  %v206_v59 = vstv %s313_s5  ;;  %s319_s11 = sld [smem:[#allocation3 + $0x12]] }
  0x49   :  { %v190_v60 = vmul.f32 %v189_v53, %v188_v56  ;;  %v207_v62 = vmul.f32 %v206_v59, %v407_v0  ;;  %v208_v63 = vstv %s314_s6  ;;  %s320_s12 = sld [smem:[#allocation3 + $0x26]] }
  0x4a   :  { %v199_v1 = vmax.f32 %v198_v58, 0.0  ;;  %s472_s13 = sld [smem:[#allocation3 + $0x3a]]  ;;  %v211_v6 = vstv %s464_s7 }
  0x4b   :  { %v191_v2 = vadd.f32 %v190_v60, %v180_v57  ;;  %v209_v3 = vadd.f32 %v208_v63, %v207_v62  ;;  %v217_v4 = vstv %s316_s8  ;;  %s322_s14 = sld [smem:[#allocation3 + $0x13]] }
  0x4c   :  { %v201_v5 = vmul.f32 %v200_v61, %v199_v1  ;;  %v218_v7 = vmul.f32 %v217_v4, %v407_v0  ;;  %v219_v8 = vstv %s317_s9  ;;  %s323_s15 = sld [smem:[#allocation3 + $0x27]] }
  0x4d   :  { %v210_v9 = vmax.f32 %v209_v3, 0.0  ;;  %s324_s16 = sld [smem:[#allocation3 + $0x3b]]  ;;  %v222_v14 = vstv %s468_s10 }
  0x4e   :  { %v202_v10 = vadd.f32 %v201_v5, %v191_v2  ;;  %v220_v11 = vadd.f32 %v219_v8, %v218_v7  ;;  %v228_v12 = vstv %s319_s11  ;;  %s325_s0 = sld [smem:[#allocation3 + $0x3c]] }
  0x4f   :  { %v212_v13 = vmul.f32 %v211_v6, %v210_v9  ;;  %v229_v15 = vmul.f32 %v228_v12, %v407_v0  ;;  %v230_v16 = vstv %s320_s12 }
  0x50   :  { %v221_v17 = vmax.f32 %v220_v11, 0.0  ;;  %v233_v22 = vstv %s472_s13 }
  0x51   :  { %v213_v18 = vadd.f32 %v212_v13, %v202_v10  ;;  %v231_v19 = vadd.f32 %v230_v16, %v229_v15  ;;  %v239_v20 = vstv %s322_s14 }
  0x52   :  { %v223_v21 = vmul.f32 %v222_v14, %v221_v17  ;;  %v240_v23 = vmul.f32 %v239_v20, %v407_v0  ;;  %v241_v24 = vstv %s323_s15 }
  0x53   :  { %v232_v25 = vmax.f32 %v231_v19, 0.0  ;;  %v244_v29 = vstv %s324_s16 }
  0x54   :  { %v224_v26 = vadd.f32 %v223_v21, %v213_v18  ;;  %v242_v27 = vadd.f32 %v241_v24, %v240_v23  ;;  %v248_v33 = vstv %s325_s0 }
  0x55   :  { %v234_v28 = vmul.f32 %v233_v22, %v232_v25 }
  0x56   :  { %v243_v30 = vmax.f32 %v242_v27, 0.0 }
  0x57   :  { %v235_v31 = vadd.f32 %v234_v28, %v224_v26 }
  0x58   :  { %v245_v32 = vmul.f32 %v244_v29, %v243_v30 }
  0x5a   :  { %v246_v34 = vadd.f32 %v245_v32, %v235_v31 }
  0x5c   :  { %v249_v35 = vadd.f32 %v248_v33, %v246_v34 }
  0x5e   :  { %250 = vst [vmem:[#allocation7] sm:$0xff] %v249_v35 }
  0x5f   :  { %368 = shalt.err (!%p365_p9)
}
  0x60   :  { %260 = dma.vmem_to_hbm [thread:$0]  %s258_s18, 128, %s485_s2, [#allocation6]  }
  0x61   :  { %381 = dma.done.wait [#allocation6], 128  }
  0x62   :  { %382 = vsyncadd [#allocation6], 4294967168 }
  0x63   :  { %264 = vsyncpa [#allocation5], 1 }
  0x64   :  { %265 = vsyncpa [#allocation6], 1 }

</bundles_post_ra>
